<compile_context>
chip_gen: v7x
topology: tpu7x:2x2x1
jax: 0.10.0
libtpu: 0.0.40
codegen_flags: <defaults>
</compile_context>

<pallas_src>
import jax
import jax.numpy as jnp
from jax.experimental import pallas as pl
from jax.experimental.pallas import tpu as pltpu


def _fhat2_kernel(x_ref, w_ref, o_ref):
    # One fused MXU matmul over K = 2N, then the +1.0 bias in f32.
    acc = jnp.dot(x_ref[...], w_ref[...], preferred_element_type=jnp.float32)
    o_ref[...] = (jnp.float32(1.0) + acc).astype(o_ref.dtype)


def fhat2_forward(x1, x2, w1, w2, mask, *, block_m=128):
    """out = 1 + x1 @ (mask*w1) + x2 @ (mask*w2), computed as one fused GEMM."""
    B, N = x1.shape
    assert x2.shape == (B, N)
    assert w1.shape == (N, N) and w2.shape == (N, N) and mask.shape == (N, N)
    out_dtype = x1.dtype

    # Fold the mask into the weights (same forward numerics as the module) and
    # stack them along K so the two matmuls become a single (B, 2N)@(2N, N) dot.
    # TODO(synk): if paired with a custom VJP for training, re-apply the mask to
    # the weight gradients so off-band entries stay frozen.
    w_stack = jnp.concatenate([mask * w1, mask * w2], axis=0)   # (2N, N)
    x = jnp.concatenate([x1, x2], axis=1)                       # (B, 2N)

    # Tile the batch/time (M) axis. Block rows are a sublane multiple (8);
    # pad B up to a whole number of blocks (padded rows produce 1.0, sliced off).
    bm = min(block_m, ((B + 7) // 8) * 8)
    pad = (-B) % bm
    if pad:
        x = jnp.pad(x, ((0, pad), (0, 0)))
    Bp = B + pad
    grid = (Bp // bm,)

    out = pl.pallas_call(
        _fhat2_kernel,
        out_shape=jax.ShapeDtypeStruct((Bp, N), out_dtype),
        grid=grid,
        in_specs=[
            pl.BlockSpec((bm, 2 * N), lambda i: (i, 0)),      # x tile streams over M
            pl.BlockSpec((2 * N, N), lambda i: (0, 0)),       # weights resident
        ],
        out_specs=pl.BlockSpec((bm, N), lambda i: (i, 0)),
        compiler_params=pltpu.CompilerParams(
            dimension_semantics=("parallel",)),               # megacore split on v7x
    )(x, w_stack)

    return out[:B] if pad else out


def make_params(key, lag, n, init_vals, dtype=jnp.float32):
    """Deterministic parameter construction mirroring the PyTorch __init__."""
    # mask = tril(triu(ones(n, n)), diagonal=lag)  -> band: 0 <= j - i <= lag
    rows = jnp.arange(n)[:, None]
    cols = jnp.arange(n)[None, :]
    band = (cols >= rows) & (cols <= rows + lag)
    mask = band.astype(dtype)

    k1, k2 = jax.random.split(key)
    (m1, s1), (m2, s2) = init_vals
    w1 = (m1 + s1 * jax.random.normal(k1, (n, n), dtype)) * mask
    w2 = (m2 + s2 * jax.random.normal(k2, (n, n), dtype)) * mask
    return mask, w1, w2


def reference_forward(x1, x2, w1, w2, mask):
    return 1.0 + x1 @ (mask * w1) + x2 @ (mask * w2)


if __name__ == "__main__":
    key = jax.random.PRNGKey(0)
    k_params, k_x1, k_x2 = jax.random.split(key, 3)

    # Many per-time-step problems stacked into one batched call
    # (e.g. 16 steps x 8 rows), so the grid actually iterates / parallelizes.
    B = 128      # stacked batch of time-series rows
    N = 32       # weight_dim -> (N, N)
    lag = 3
    init_vals = [(0.0, 0.1), (0.0, 0.1)]

    mask, w1, w2 = make_params(k_params, lag, N, init_vals)
    x1 = jax.random.normal(k_x1, (B, N), jnp.float32)
    x2 = jax.random.normal(k_x2, (B, N), jnp.float32)

    out = fhat2_forward(x1, x2, w1, w2, mask, block_m=64)   # grid=(2,)
    out = jax.block_until_ready(out)

    ref = reference_forward(x1, x2, w1, w2, mask)
    assert out.shape == (B, N)
    assert jnp.allclose(out, ref, atol=1e-5, rtol=1e-5), "mismatch vs reference"

    print("KERNEL_OK")
</pallas_src>

<mosaic_0001>
module attributes {stable_mosaic.version = 11 : i64} {
  func.func @_fhat2_kernel(%arg0: i32, %arg1: memref<64x64xf32, #tpu.memory_space<vmem>>, %arg2: memref<64x32xf32, #tpu.memory_space<vmem>>, %arg3: memref<64x32xf32, #tpu.memory_space<vmem>>) attributes {dimension_semantics = [#tpu.dimension_semantics<parallel>], iteration_bounds = array<i64: 2>, scalar_prefetch = 0 : i64, scratch_operands = 0 : i64, tpu.core_type = #tpu.core_type<tc>, window_params = [{transform_indices = @transform_0, window_bounds = array<i64: 64, 64>}, {pipeline_mode = #tpu.pipeline_mode<synchronous>, transform_indices = @transform_1, window_bounds = array<i64: 64, 32>}, {transform_indices = @transform_2, window_bounds = array<i64: 64, 32>}]} {
    %c0 = arith.constant 0 : index
    %c0_0 = arith.constant 0 : index
    %0 = vector.load %arg1[%c0, %c0_0] : memref<64x64xf32, #tpu.memory_space<vmem>>, vector<64x64xf32>
    %c0_1 = arith.constant 0 : index
    %c0_2 = arith.constant 0 : index
    %1 = vector.load %arg2[%c0_1, %c0_2] : memref<64x32xf32, #tpu.memory_space<vmem>>, vector<64x32xf32>
    %cst = arith.constant dense<0.000000e+00> : vector<64x32xf32>
    %2 = tpu.matmul %0, %1, %cst {dimension_numbers = #tpu.dot_dimension_numbers<[1], [0], [0], [1], [0, 0, 1, 1], [], []>} : vector<64x64xf32>, vector<64x32xf32>, vector<64x32xf32> -> vector<64x32xf32>
    %cst_3 = arith.constant 1.000000e+00 : f32
    %3 = vector.broadcast %cst_3 : f32 to vector<64x32xf32>
    %4 = arith.addf %3, %2 : vector<64x32xf32>
    %c0_4 = arith.constant 0 : index
    %c0_5 = arith.constant 0 : index
    %5 = vector.load %arg3[%c0_4, %c0_5] : memref<64x32xf32, #tpu.memory_space<vmem>>, vector<64x32xf32>
    tpu.vector_store %arg3[%c0_4, %c0_5], %4 {strides = array<i32>} : memref<64x32xf32, #tpu.memory_space<vmem>>, vector<64x32xf32>,
    return
  }
  func.func @transform_0(%arg0: i32) -> (i32, i32) {
    %c0_i32 = arith.constant 0 : i32
    %c0_i32_0 = arith.constant 0 : i32
    return %arg0, %c0_i32 : i32, i32
  }
  func.func @transform_1(%arg0: i32) -> (i32, i32) {
    %c0_i32 = arith.constant 0 : i32
    %c0_i32_0 = arith.constant 0 : i32
    %c0_i32_1 = arith.constant 0 : i32
    return %c0_i32, %c0_i32_0 : i32, i32
  }
  func.func @transform_2(%arg0: i32) -> (i32, i32) {
    %c0_i32 = arith.constant 0 : i32
    %c0_i32_0 = arith.constant 0 : i32
    return %arg0, %c0_i32 : i32, i32
  }
}

</mosaic_0001>

<bundles_post_ra>
// kernel: tpu_custom_call.1
= control target key start
LH: loop header
LB: loop body
LE: loop exit
PB: predicated region body
PF: predicated region fallthrough
CT: control target
= control target key end

     0   :  { %s476_s9 = smov 0   ;;  %s540_s0 = inlined_call_operand.vmem [shape: f32[128,64], index: 0, kind: input, shape index: {}]   ;;  %s541_s1 = inlined_call_operand.vmem [shape: f32[64,32], index: 1, kind: input, shape index: {}]   ;;  %s542_s2 = inlined_call_operand.vmem [shape: f32[128,32], index: 2, kind: output, shape index: {}]  }
   0x1 LB: > { %s358_s10 = sadd.s32 4294967295, %s459_s9   ;;  %p362_p0 = scmp.ge.s32.totalorder %s459_s9, 1  ;;  %s459_s9 = sphi %s476_s9, %s12_s9  }
   0x2   : > { %p113_p1 = scmp.lt.s32.totalorder %s459_s9, 3 }
   0x4   : > { %p114_p2 = pnand %p362_p0, %p113_p1 }
   0x5   : > { %v155_v0 = vld [vmem:[%s541_s1] sm:$0xff] (!%p114_p2)  ;;  %v156_v1 = vld [vmem:[%s541_s1 + $0x8] sm:$0xff] (!%p114_p2)  ;;  %v157_v2 = vld [vmem:[%s541_s1 + $0x10] sm:$0xff] (!%p114_p2)  ;;  %s363_s17 = sshll.u32 (!%p114_p2), %s358_s10, 3  ;;  %vm163_vm0 = vcmask (!%p114_p2), 523264   ;;  %vm293_vm1 = vcmask (!%p114_p2), 261120  }
   0x6   : > { %117 = sbr.rel (%p114_p2) target bundleno = 245 (0xf5), region = 28  ;;  %v421_v3 = vpack.c.bf16 (!%p114_p2), %v156_v1, %v155_v0  ;;  %v158_v4 = vld [vmem:[%s541_s1 + $0x18] sm:$0xff] (!%p114_p2)  ;;  %p136_p3 = scmp.lt.s32.totalorder (!%p114_p2), %s363_s17, 15  ;;  %v159_v6 = vld [vmem:[%s541_s1 + $0x20] sm:$0xff] (!%p114_p2)  ;;  %v160_v7 = vld [vmem:[%s541_s1 + $0x28] sm:$0xff] (!%p114_p2) }
   0x7   : > { %v425_v5 = vpack.c.bf16 (!%p114_p2), %v158_v4, %v157_v2  ;;  %v429_v8 = vpack.c.bf16 (!%p114_p2), %v160_v7, %v159_v6  ;;  %v161_v9 = vld [vmem:[%s541_s1 + $0x30] sm:$0xff] (!%p114_p2)  ;;  %v162_v10 = vld [vmem:[%s541_s1 + $0x38] sm:$0xff] (!%p114_p2) }
   0x8   : > { %422 = vmatprep.subr.bf16.mxu0 (!%p114_p2), %v421_v3  ;;  %437 = vmatprep.subr.bf16.mxu1 (!%p114_p2), %v421_v3  ;;  %v433_v13 = vpack.c.bf16 (!%p114_p2), %v162_v10, %v161_v9 }
   0x9   : > { %424 = vmatpush3.bf16.msra.mxu0 (!%p114_p2), %v421_v3  ;;  %441 = vmatpush3.bf16.msra.mxu1 (!%p114_p2), %v421_v3 }
   0xa   : > { %426 = vmatprep.subr.bf16.mxu0 (!%p114_p2), %v425_v5  ;;  %438 = vmatprep.subr.bf16.mxu1 (!%p114_p2), %v425_v5 }
   0xd   : > { %s544_s17 = smov (!%p136_p3, %s363_s17), 15  ;;  %428 = vmatpush3.bf16.msra.mxu0 %v425_v5  ;;  %442 = vmatpush3.bf16.msra.mxu1 %v425_v5 }
   0xe   : > { %s364_s24 = sshll.u32 %s544_s17, 3  ;;  %430 = vmatprep.subr.bf16.mxu0 %v429_v8  ;;  %439 = vmatprep.subr.bf16.mxu1 %v429_v8 }
   0xf   : > { %s139_s3 = scalar_lea.vmem %s540_s0, %s364_s24  ;;  %s145_s6 = scalar_lea.vmem %s542_s2, %s364_s24 }
  0x10   : > { %v147_v11 = vld [vmem:[%s139_s3] sm:$0xff]  ;;  %v148_v14 = vld [vmem:[%s139_s3 + $0x8] sm:$0xff]  ;;  %v149_v16 = vld [vmem:[%s139_s3 + $0x10] sm:$0xff] }
  0x11   : > { %v151_v12 = vld [vmem:[%s139_s3 + $0x20] sm:$0xff]  ;;  %409 = vmatprep.mubr.msk.f32.mxu0 %vm163_vm0, %v147_v11  ;;  %432 = vmatpush3.bf16.msra.mxu0 %v429_v8  ;;  %v152_v15 = vld [vmem:[%s139_s3 + $0x28] sm:$0xff]  ;;  %v153_v17 = vld [vmem:[%s139_s3 + $0x30] sm:$0xff] }
  0x12   : > { %415 = vmatprep.mubr.msk.f32.mxu1 %vm163_vm0, %v151_v12  ;;  %443 = vmatpush3.bf16.msra.mxu1 %v429_v8  ;;  %v150_v18 = vld [vmem:[%s139_s3 + $0x18] sm:$0xff] }
  0x13   : > { %434 = vmatprep.subr.bf16.mxu0 %v433_v13  ;;  %440 = vmatprep.subr.bf16.mxu1 %v433_v13  ;;  %v154_v19 = vld [vmem:[%s139_s3 + $0x38] sm:$0xff] }
  0x15   : > { %436 = vmatpush3.bf16.msra.mxu0 %v433_v13 }
  0x16   : > { %444 = vmatpush3.bf16.msra.mxu1 %v433_v13 }
  0x18   : > { %410 = vmatmul.mubr.msk.f32.vlgmr.msra.gmra.mrb[0].mxu0 %vm163_vm0, %v148_v14 }
  0x19   : > { %416 = vmatmul.mubr.msk.f32.vlgmr.msra.gmra.mrb[0].mxu1 %vm163_vm0, %v152_v15  ;;  %412 = vmatprep.mubr.msk.f32.mxu0 %vm163_vm0, %v149_v16 }
  0x1a   : > { %418 = vmatprep.mubr.msk.f32.mxu1 %vm163_vm0, %v153_v17 }
  0x1c   : > { %413 = vmatmul.mubr.msk.f32.gmra.mrb[2].mxu0 %vm163_vm0, %v150_v18 }
  0x1d   : > { %419 = vmatmul.mubr.msk.f32.gmra.mrb[2].mxu1 %vm163_vm0, %v154_v19 }
  0xeb   : > { %v411_v20 = vpop.f32.mrb[0].mxu0 }
  0xec   : > { %v417_v21 = vpop.f32.mrb[0].mxu1  ;;  %v260_v22 = vadd.f32 1.0, %v411_v20  ;;  %v254_v24 = vpop.f32.mrb[1].mxu0 }
  0xed   : > { %v280_v23 = vadd.f32 1.0, %v417_v21  ;;  %v274_v25 = vpop.f32.mrb[1].mxu1  ;;  %v255_v26 = vadd.f32 1.0, %v254_v24 }
  0xee   : > { %v275_v27 = vadd.f32 1.0, %v274_v25  ;;  %295 = vst.msk [vmem:[%s145_s6 + $0x8] sm:$0xff] %vm293_vm1, %v260_v22 }
  0xef   : > { %299 = vst.msk [vmem:[%s145_s6 + $0x28] sm:$0xff] %vm293_vm1, %v280_v23  ;;  %294 = vst.msk [vmem:[%s145_s6] sm:$0xff] %vm293_vm1, %v255_v26  ;;  %v414_v28 = vpop.f32.mrb[2].mxu0 }
  0xf0   : > { %298 = vst.msk [vmem:[%s145_s6 + $0x20] sm:$0xff] %vm293_vm1, %v275_v27  ;;  %v420_v29 = vpop.f32.mrb[2].mxu1  ;;  %v270_v30 = vadd.f32 1.0, %v414_v28  ;;  %v264_v32 = vpop.f32.mrb[3].mxu0 }
  0xf1   : > { %v290_v31 = vadd.f32 1.0, %v420_v29  ;;  %v284_v33 = vpop.f32.mrb[3].mxu1  ;;  %v265_v34 = vadd.f32 1.0, %v264_v32 }
  0xf2   : > { %v285_v35 = vadd.f32 1.0, %v284_v33  ;;  %297 = vst.msk [vmem:[%s145_s6 + $0x18] sm:$0xff] %vm293_vm1, %v270_v30 }
  0xf3   : > { %301 = vst.msk [vmem:[%s145_s6 + $0x38] sm:$0xff] %vm293_vm1, %v290_v31  ;;  %296 = vst.msk [vmem:[%s145_s6 + $0x10] sm:$0xff] %vm293_vm1, %v265_v34 }
  0xf4   : > { %300 = vst.msk [vmem:[%s145_s6 + $0x30] sm:$0xff] %vm293_vm1, %v285_v35 }
  0xf5 PF: > { %s12_s9 = sadd.s32 1, %s459_s9  }
  0xf6   : > { %p9_p4 = scmp.ge.s32.totalorder %s12_s9, 4  }
  0xf8   :  { %11 = sbr.rel (!%p9_p4) target bundleno = 1 (0x1), region = 58 }

</bundles_post_ra>
